<compile_context>
chip_gen: v7x
topology: tpu7x:2x2x1
jax: 0.10.0
libtpu: 0.0.40
codegen_flags: <defaults>
</compile_context>

<pallas_src>
import functools

import jax
import jax.numpy as jnp
from jax.experimental import pallas as pl
from jax.experimental.pallas import tpu as pltpu


def _coordconv_kernel(x_ref, w_ref, b_ref, o_ref, *, KH, KW, Wp, HW):
    """Fused AddCoords+Conv2d: one MXU matmul per grid step.

    x_ref : (bb, Cin_p, L)  bf16 - coord channels folded in, channels zero
            padded to a multiple of 8, padded spatial dims flattened with row
            stride Wp, L >= (KH-1)*Wp + (KW-1) + HW (zero padded, mult of 128).
    w_ref : (Cout, KH*KW*Cin_p) bf16 - rows ordered (kh, kw, c).
    b_ref : (Cout, 1) f32.
    o_ref : (bb, Cout, HW) f32 - channels-first, lane-dense (HW = k*128).
    """
    bb = x_ref.shape[0]
    w = w_ref[...]                      # bf16, no in-kernel casts
    b = b_ref[...]                      # (Cout, 1) f32

    # im2col: tap (kh, kw) of the KHxKW window is the contiguous lane slice of
    # the flattened padded image starting at kh*Wp + kw.  Per-image columns
    # are concatenated on the lane axis (HW is a multiple of 128, so every
    # lane boundary is tile aligned) so the whole grid step is ONE matmul.
    cols = jnp.concatenate(
        [jnp.concatenate(
            [x_ref[i, :, kh * Wp + kw: kh * Wp + kw + HW]
             for kh in range(KH) for kw in range(KW)],
            axis=0)                                     # (KH*KW*Cin_p, HW)
         for i in range(bb)],
        axis=1)                                         # (KH*KW*Cin_p, bb*HW)

    acc = jnp.dot(w, cols, preferred_element_type=jnp.float32)  # (Cout, bb*HW)
    out = acc + b                                               # f32 bias add
    for i in range(bb):                 # bb unmasked lane-dense (Cout, HW) stores
        o_ref[i] = out[:, i * HW:(i + 1) * HW].astype(o_ref.dtype)


def _round_up(x, m):
    return (x + m - 1) // m * m


def _pick_batch_block(B, per_image_bytes, *, vmem_budget=2 << 20, min_steps=4):
    """Largest bb that keeps per-step blocks small (double-buffer friendly on
    v7x's 64 MiB VMEM / v5e's 16 MiB scoped default) while leaving several
    grid steps so BlockSpec pipelining can overlap DMA with compute."""
    bb = max(1, min(B, vmem_budget // max(per_image_bytes, 1)))
    bb = min(bb, max(1, B // min(min_steps, B)))
    while B % bb:
        bb -= 1
    return bb


def coordconv_forward(x_nchw, weight_oihw, bias, *, pad=1, batch_block=None):
    """CoordConv forward: AddCoords(with_r=False) + Conv2d(k=3, s=1, p=1, bias).

    x_nchw      : (B, Cin0, H, W) float32
    weight_oihw : (Cout, Cin0+2, KH, KW) float32 (PyTorch Conv2d layout)
    bias        : (Cout,) float32
    returns     : (B, Cout, H, W) float32
    """
    B, Cin0, H, W = x_nchw.shape
    Cout, Cin, KH, KW = weight_oihw.shape
    assert Cin == Cin0 + 2, "AddCoords(with_r=False) appends exactly 2 channels"
    assert KH == 2 * pad + 1 and KW == 2 * pad + 1, "written for 'same' stride-1 conv"

    f32, bf16 = jnp.float32, jnp.bfloat16

    # ---- AddCoords (batch independent -> computed once, outside the kernel).
    # xx varies along H, yy varies along W (PyTorch AddCoords semantics).
    # max(., 1) only changes the degenerate H==1 / W==1 case (PyTorch would
    # divide by zero there).
    xs = jnp.arange(H, dtype=f32) / max(H - 1, 1) * 2.0 - 1.0
    ys = jnp.arange(W, dtype=f32) / max(W - 1, 1) * 2.0 - 1.0
    xx = jnp.broadcast_to(xs[None, None, :, None], (B, 1, H, W))
    yy = jnp.broadcast_to(ys[None, None, None, :], (B, 1, H, W))
    feat = jnp.concatenate([x_nchw.astype(f32), xx, yy], axis=1)  # (B, Cin, H, W)

    # ---- pad channels to a multiple of 8, zero-pad H/W for the conv, flatten
    # spatial with the padded row stride Wp.  Cast to bf16 HERE so the kernel
    # DMAs half the bytes and does no casts. ----------------------------------
    Cin_p = _round_up(Cin, 8)
    Hp, Wp = H + 2 * pad, W + 2 * pad
    feat = jnp.pad(feat, ((0, 0), (0, Cin_p - Cin), (pad, pad), (pad, pad)))
    x_flat = feat.reshape(B, Cin_p, Hp * Wp)

    HW = _round_up(H * Wp, 128)        # lane-dense output width (multiple of 128)
    L = _round_up(max(Hp * Wp, (KH - 1) * Wp + (KW - 1) + HW), 128)
    x_flat = jnp.pad(x_flat, ((0, 0), (0, 0), (0, L - Hp * Wp))).astype(bf16)

    # ---- weights/bias in matmul layout: (Cout, KH*KW*Cin_p), rows (kh,kw,c) --
    w_t = jnp.transpose(weight_oihw, (0, 2, 3, 1))            # (Cout, KH, KW, Cin)
    w_t = jnp.pad(w_t, ((0, 0), (0, 0), (0, 0), (0, Cin_p - Cin)))
    w2 = w_t.reshape(Cout, KH * KW * Cin_p).astype(bf16)
    b2 = bias.reshape(Cout, 1).astype(f32)

    # ---- batch blocking: small per-step blocks, several pipelined grid steps.
    # TODO(synk): for large H/W add a row-block grid axis with a (KH-1)-row
    # halo so the per-step input block stays ~1-2 MB instead of a full image.
    per_image_bytes = Cin_p * L * 2 + Cout * HW * 4           # bf16 in + f32 out
    if batch_block is None:
        bb = _pick_batch_block(B, per_image_bytes)
    else:
        bb = max(1, min(B, int(batch_block)))
        if B % bb:
            bb = 1
    grid = (B // bb,)

    kernel = functools.partial(_coordconv_kernel, KH=KH, KW=KW, Wp=Wp, HW=HW)
    out_wide = pl.pallas_call(
        kernel,
        out_shape=jax.ShapeDtypeStruct((B, Cout, HW), f32),
        grid_spec=pltpu.PrefetchScalarGridSpec(
            num_scalar_prefetch=0,
            grid=grid,
            in_specs=[
                pl.BlockSpec((bb, Cin_p, L), lambda g: (g, 0, 0)),
                pl.BlockSpec((Cout, KH * KW * Cin_p), lambda g: (0, 0)),
                pl.BlockSpec((Cout, 1), lambda g: (0, 0)),
            ],
            out_specs=pl.BlockSpec((bb, Cout, HW), lambda g: (g, 0, 0)),
        ),
        compiler_params=pltpu.CompilerParams(
            dimension_semantics=("parallel",),
            vmem_limit_bytes=32 * 1024 * 1024),
    )(x_flat, w2, b2)

    # Output is already channels-first; drop the lane padding and the (Wp - W)
    # wrap-around columns.
    return out_wide[:, :, :H * Wp].reshape(B, Cout, H, Wp)[:, :, :, :W]


def coordconv_reference(x_nchw, weight_oihw, bias, *, pad=1, dot_dtype=None,
                        precision=None):
    """Pure-JAX reference reproducing the PyTorch module semantics."""
    B, C, H, W = x_nchw.shape
    f32 = jnp.float32
    xs = jnp.arange(H, dtype=f32) / max(H - 1, 1) * 2.0 - 1.0
    ys = jnp.arange(W, dtype=f32) / max(W - 1, 1) * 2.0 - 1.0
    xx = jnp.broadcast_to(xs[None, None, :, None], (B, 1, H, W))
    yy = jnp.broadcast_to(ys[None, None, None, :], (B, 1, H, W))
    feat = jnp.concatenate([x_nchw.astype(f32), xx, yy], axis=1)
    w = weight_oihw
    if dot_dtype is not None:
        feat = feat.astype(dot_dtype)
        w = w.astype(dot_dtype)
    out = jax.lax.conv_general_dilated(
        feat, w,
        window_strides=(1, 1),
        padding=[(pad, pad), (pad, pad)],
        dimension_numbers=("NCHW", "OIHW", "NCHW"),
        preferred_element_type=f32,
        precision=precision)
    return out + bias[None, :, None, None].astype(f32)


if __name__ == "__main__":
    B, Cin0, H, W = 2, 4, 16, 16
    Cout, KH, KW = 8, 3, 3
    Cin = Cin0 + 2  # AddCoords appends 2 channels (with_r=False)

    key = jax.random.PRNGKey(0)
    kx, kw_, kb = jax.random.split(key, 3)
    x = jax.random.normal(kx, (B, Cin0, H, W), dtype=jnp.float32)
    weight = jax.random.normal(kw_, (Cout, Cin, KH, KW), dtype=jnp.float32) * 0.1
    bias = jax.random.normal(kb, (Cout,), dtype=jnp.float32) * 0.1

    out = jax.jit(coordconv_forward)(x, weight, bias)
    out = jax.block_until_ready(out)
    assert out.shape == (B, Cout, H, W)

    # 1) precision-matched check: reference also uses bf16 operands with f32
    #    accumulation, so any residual difference is summation order only.
    ref_bf16 = coordconv_reference(x, weight, bias, dot_dtype=jnp.bfloat16)
    assert bool(jnp.allclose(out, ref_bf16, atol=2e-3, rtol=2e-3)), (
        "mismatch vs bf16-matched reference, max abs err = "
        f"{float(jnp.max(jnp.abs(out - ref_bf16)))}")

    # 2) sanity check vs the full-f32 reference; tolerance covers the bf16 MXU
    #    operand rounding chosen for performance.
    ref_f32 = coordconv_reference(x, weight, bias,
                                  precision=jax.lax.Precision.HIGHEST)
    assert bool(jnp.allclose(out, ref_f32, atol=2e-2, rtol=2e-2)), (
        "mismatch vs f32 reference, max abs err = "
        f"{float(jnp.max(jnp.abs(out - ref_f32)))}")

    print("KERNEL_OK")
</pallas_src>

<mosaic_0001>
module attributes {stable_mosaic.version = 11 : i64} {
  func.func @_coordconv_kernel(%arg0: i32, %arg1: memref<1x8x512xbf16, #tpu.memory_space<vmem>>, %arg2: memref<8x72xbf16, #tpu.memory_space<vmem>>, %arg3: memref<8x1xf32, #tpu.memory_space<vmem>>, %arg4: memref<1x8x384xf32, #tpu.memory_space<vmem>>) attributes {dimension_semantics = [#tpu.dimension_semantics<parallel>], iteration_bounds = array<i64: 2>, scalar_prefetch = 0 : i64, scratch_operands = 0 : i64, tpu.core_type = #tpu.core_type<tc>, window_params = [{transform_indices = @transform_0, window_bounds = array<i64: 1, 8, 512>}, {pipeline_mode = #tpu.pipeline_mode<synchronous>, transform_indices = @transform_1, window_bounds = array<i64: 8, 72>}, {pipeline_mode = #tpu.pipeline_mode<synchronous>, transform_indices = @transform_2, window_bounds = array<i64: 8, 1>}, {transform_indices = @transform_3, window_bounds = array<i64: 1, 8, 384>}]} {
    %c0 = arith.constant 0 : index
    %c0_0 = arith.constant 0 : index
    %0 = vector.load %arg2[%c0, %c0_0] : memref<8x72xbf16, #tpu.memory_space<vmem>>, vector<8x72xbf16>
    %c0_1 = arith.constant 0 : index
    %c0_2 = arith.constant 0 : index
    %1 = vector.load %arg3[%c0_1, %c0_2] : memref<8x1xf32, #tpu.memory_space<vmem>>, vector<8x1xf32>
    %c0_3 = arith.constant 0 : index
    %c0_4 = arith.constant 0 : index
    %c0_5 = arith.constant 0 : index
    %2 = vector.load %arg1[%c0_3, %c0_4, %c0_5] : memref<1x8x512xbf16, #tpu.memory_space<vmem>>, vector<1x8x384xbf16>
    %3 = vector.shape_cast %2 : vector<1x8x384xbf16> to vector<8x384xbf16>
    %c0_6 = arith.constant 0 : index
    %c0_7 = arith.constant 0 : index
    %c1 = arith.constant 1 : index
    %4 = vector.load %arg1[%c0_6, %c0_7, %c1] : memref<1x8x512xbf16, #tpu.memory_space<vmem>>, vector<1x8x384xbf16>
    %5 = vector.shape_cast %4 : vector<1x8x384xbf16> to vector<8x384xbf16>
    %c0_8 = arith.constant 0 : index
    %c0_9 = arith.constant 0 : index
    %c2 = arith.constant 2 : index
    %6 = vector.load %arg1[%c0_8, %c0_9, %c2] : memref<1x8x512xbf16, #tpu.memory_space<vmem>>, vector<1x8x384xbf16>
    %7 = vector.shape_cast %6 : vector<1x8x384xbf16> to vector<8x384xbf16>
    %c0_10 = arith.constant 0 : index
    %c0_11 = arith.constant 0 : index
    %c18 = arith.constant 18 : index
    %8 = vector.load %arg1[%c0_10, %c0_11, %c18] : memref<1x8x512xbf16, #tpu.memory_space<vmem>>, vector<1x8x384xbf16>
    %9 = vector.shape_cast %8 : vector<1x8x384xbf16> to vector<8x384xbf16>
    %c0_12 = arith.constant 0 : index
    %c0_13 = arith.constant 0 : index
    %c19 = arith.constant 19 : index
    %10 = vector.load %arg1[%c0_12, %c0_13, %c19] : memref<1x8x512xbf16, #tpu.memory_space<vmem>>, vector<1x8x384xbf16>
    %11 = vector.shape_cast %10 : vector<1x8x384xbf16> to vector<8x384xbf16>
    %c0_14 = arith.constant 0 : index
    %c0_15 = arith.constant 0 : index
    %c20 = arith.constant 20 : index
    %12 = vector.load %arg1[%c0_14, %c0_15, %c20] : memref<1x8x512xbf16, #tpu.memory_space<vmem>>, vector<1x8x384xbf16>
    %13 = vector.shape_cast %12 : vector<1x8x384xbf16> to vector<8x384xbf16>
    %c0_16 = arith.constant 0 : index
    %c0_17 = arith.constant 0 : index
    %c36 = arith.constant 36 : index
    %14 = vector.load %arg1[%c0_16, %c0_17, %c36] : memref<1x8x512xbf16, #tpu.memory_space<vmem>>, vector<1x8x384xbf16>
    %15 = vector.shape_cast %14 : vector<1x8x384xbf16> to vector<8x384xbf16>
    %c0_18 = arith.constant 0 : index
    %c0_19 = arith.constant 0 : index
    %c37 = arith.constant 37 : index
    %16 = vector.load %arg1[%c0_18, %c0_19, %c37] : memref<1x8x512xbf16, #tpu.memory_space<vmem>>, vector<1x8x384xbf16>
    %17 = vector.shape_cast %16 : vector<1x8x384xbf16> to vector<8x384xbf16>
    %c0_20 = arith.constant 0 : index
    %c0_21 = arith.constant 0 : index
    %c38 = arith.constant 38 : index
    %18 = vector.load %arg1[%c0_20, %c0_21, %c38] : memref<1x8x512xbf16, #tpu.memory_space<vmem>>, vector<1x8x384xbf16>
    %19 = vector.shape_cast %18 : vector<1x8x384xbf16> to vector<8x384xbf16>
    %20 = tpu.concatenate %3, %5, %7, %9, %11, %13, %15, %17, %19 in 0 : vector<8x384xbf16>, vector<8x384xbf16>, vector<8x384xbf16>, vector<8x384xbf16>, vector<8x384xbf16>, vector<8x384xbf16>, vector<8x384xbf16>, vector<8x384xbf16>, vector<8x384xbf16> -> vector<72x384xbf16>
    %cst = arith.constant dense<0.000000e+00> : vector<8x384xf32>
    %21 = tpu.matmul %0, %20, %cst {dimension_numbers = #tpu.dot_dimension_numbers<[1], [0], [0], [1], [0, 0, 1, 1], [], []>} : vector<8x72xbf16>, vector<72x384xbf16>, vector<8x384xf32> -> vector<8x384xf32>
    %22 = vector.broadcast %1 : vector<8x1xf32> to vector<8x384xf32>
    %23 = arith.addf %21, %22 : vector<8x384xf32>
    %c0_22 = arith.constant 0 : index
    %c0_23 = arith.constant 0 : index
    %c0_24 = arith.constant 0 : index
    %24 = vector.load %arg4[%c0_22, %c0_23, %c0_24] : memref<1x8x384xf32, #tpu.memory_space<vmem>>, vector<1x8x384xf32>
    %25 = vector.shape_cast %24 : vector<1x8x384xf32> to vector<8x384xf32>
    %26 = vector.shape_cast %23 : vector<8x384xf32> to vector<1x8x384xf32>
    tpu.vector_store %arg4[%c0_22, %c0_23, %c0_24], %26 {strides = array<i32>} : memref<1x8x384xf32, #tpu.memory_space<vmem>>, vector<1x8x384xf32>,
    return
  }
  func.func @transform_0(%arg0: i32) -> (i32, i32, i32) {
    %c0_i32 = arith.constant 0 : i32
    %c0_i32_0 = arith.constant 0 : i32
    %c0_i32_1 = arith.constant 0 : i32
    return %arg0, %c0_i32, %c0_i32_0 : i32, i32, i32
  }
  func.func @transform_1(%arg0: i32) -> (i32, i32) {
    %c0_i32 = arith.constant 0 : i32
    %c0_i32_0 = arith.constant 0 : i32
    %c0_i32_1 = arith.constant 0 : i32
    return %c0_i32, %c0_i32_0 : i32, i32
  }
  func.func @transform_2(%arg0: i32) -> (i32, i32) {
    %c0_i32 = arith.constant 0 : i32
    %c0_i32_0 = arith.constant 0 : i32
    %c0_i32_1 = arith.constant 0 : i32
    return %c0_i32, %c0_i32_0 : i32, i32
  }
  func.func @transform_3(%arg0: i32) -> (i32, i32, i32) {
    %c0_i32 = arith.constant 0 : i32
    %c0_i32_0 = arith.constant 0 : i32
    %c0_i32_1 = arith.constant 0 : i32
    return %arg0, %c0_i32, %c0_i32_0 : i32, i32, i32
  }
}

</mosaic_0001>

<bundles_post_ra>
// kernel: coordconv_forward.1
= control target key start
LH: loop header
LB: loop body
LE: loop exit
PB: predicated region body
PF: predicated region fallthrough
CT: control target
= control target key end

     0   :  { %s604_s12 = smov 0   ;;  %s686_s0 = inlined_call_operand.vmem [shape: bf16[2,8,512], index: 0, kind: input, shape index: {}]   ;;  %s687_s1 = inlined_call_operand.vmem [shape: bf16[8,72], index: 1, kind: input, shape index: {}]   ;;  %s688_s2 = inlined_call_operand.vmem [shape: f32[8,1], index: 2, kind: input, shape index: {}]   ;;  %s689_s3 = inlined_call_operand.vmem [shape: f32[2,8,384], index: 3, kind: output, shape index: {}]  }
   0x1 LB: > { %s498_s13 = sadd.s32 4294967295, %s571_s12   ;;  %p502_p0 = scmp.ge.s32.totalorder %s571_s12, 1  ;;  %s571_s12 = sphi %s604_s12, %s13_s12  }
   0x2   : > { %p137_p1 = scmp.lt.s32.totalorder %s571_s12, 3 }
   0x4   : > { %p138_p2 = pnand %p502_p0, %p137_p1 }
   0x5   : > { %p161_p3 = scmp.lt.s32.totalorder (!%p138_p2), %s498_s13, 1  ;;  %v573_v0 = vmov (!%p138_p2), 0.0   ;;  %s574_s18 = smov (!%p138_p2), 127   ;;  %v581_v7 = vmov (!%p138_p2), 0   ;;  %vm582_vm0 = vmmov (!%p138_p2), 0   ;;  %v173_v8 = vld [vmem:[%s688_s2] sm:$0xff] (!%p138_p2) }
   0x6   : > { %141 = sbr.rel (%p138_p2) target bundleno = 415 (0x19f), region = 32  ;;  %525 = vmatprep.subr.bf16.mxu1 (!%p138_p2), %v573_v0  ;;  %s575_s19 = smov (!%p138_p2), 126   ;;  %391 = vmatprep.mubr.bf16.mxu0 (!%p138_p2), %v581_v7  ;;  %vm204_vm1 = vcmask (!%p138_p2), 1039360   ;;  %vm292_vm2 = vcmask (!%p138_p2), 1043456   ;;  %vm216_vm3 = vcmask (!%p138_p2), 1031168   ;;  %vm228_vm4 = vcmask (!%p138_p2), 900096  }
   0x7   : > { %s576_s20 = smov (!%p138_p2), 110   ;;  %s577_s21 = smov (!%p138_p2), 109   ;;  %535 = vmatprep.mubr.msk.bf16.mxu1 (!%p138_p2), %vm582_vm0, %v573_v0  ;;  %559 = vset.pattern.permute.xlu0 (!%p138_p2), %v581_v7  ;;  %vm240_vm5 = vcmask (!%p138_p2), 891904   ;;  %vm252_vm6 = vcmask (!%p138_p2), 883712   ;;  %vm264_vm7 = vcmask (!%p138_p2), 752640   ;;  %vm276_vm8 = vcmask (!%p138_p2), 744448  }
   0x8   : > { %s578_s22 = smov (!%p138_p2), 108   ;;  %s579_s23 = smov (!%p138_p2), 92   ;;  %vm288_vm9 = vcmask (!%p138_p2), 736256   ;;  %vm346_vm10 = vcmask (!%p138_p2), 588800  }
   0x9   : > { %s580_s24 = smov (!%p138_p2), 91   ;;  %s583_s25 = smov (!%p138_p2), 90  }
   0xd   : > { %s691_s13 = smov (!%p161_p3, %s498_s13), 1 }
   0xe   : > { %s518_s14 = sshll.u32 %s691_s13, 4  ;;  %s539_s30 = smul.u32 24, %s691_s13 }
   0xf   : > { %s619_s17 = scalar_lea.vmem %s686_s0, %s518_s14 }
  0x10   : > { %v176_v1 = vld [vmem:[%s619_s17] sm:$0xff]  ;;  %v177_v2 = vld [vmem:[%s619_s17 + $0x8] sm:$0xff]  ;;  %s170_s6 = scalar_lea.vmem %s689_s3, %s539_s30 }
  0x11   : > { %v510_v3 = vcombine.high %v176_v1, %v176_v1  ;;  %v623_v4 = vcombine.low %v176_v1, %v176_v1  ;;  %v511_v5 = vcombine.low %v177_v2, %v177_v2  ;;  %v512_v6 = vcombine.high %v177_v2, %v177_v2  ;;  %v564_v11 = vld [vmem:[%s619_s17 + $0x8] ss:$0 sps:$4 sm:$0xff]  }
  0x13   : > { %198 = vrot.lane.b32.xlu0 %v510_v3, %s574_s18  ;;  %196 = vrot.lane.b32.xlu1 %v623_v4, %s574_s18 }
  0x17   : > { %200 = vrot.lane.b32.xlu0 %v511_v5, %s574_s18  ;;  %202 = vrot.lane.b32.xlu1 %v512_v6, %s574_s18 }
  0x1b   : > { %210 = vrot.lane.b32.xlu0 %v510_v3, %s575_s19  ;;  %212 = vrot.lane.b32.xlu1 %v511_v5, %s575_s19 }
  0x1f   : > { %222 = vrot.lane.b32.xlu0 %v510_v3, %s576_s20  ;;  %224 = vrot.lane.b32.xlu1 %v511_v5, %s576_s20 }
  0x23   : > { %208 = vrot.lane.b32.xlu0 %v623_v4, %s575_s19  ;;  %220 = vrot.lane.b32.xlu1 %v623_v4, %s576_s20 }
  0x27   : > { %214 = vrot.lane.b32.xlu0 %v512_v6, %s575_s19  ;;  %226 = vrot.lane.b32.xlu1 %v512_v6, %s576_s20 }
  0x2b   : > { %234 = vrot.lane.b32.xlu0 %v510_v3, %s577_s21  ;;  %236 = vrot.lane.b32.xlu1 %v511_v5, %s577_s21 }
  0x2f   : > { %246 = vrot.lane.b32.xlu0 %v510_v3, %s578_s22  ;;  %248 = vrot.lane.b32.xlu1 %v511_v5, %s578_s22 }
  0x33   : > { %232 = vrot.lane.b32.xlu0 %v623_v4, %s577_s21  ;;  %244 = vrot.lane.b32.xlu1 %v623_v4, %s578_s22 }
  0x37   : > { %238 = vrot.lane.b32.xlu0 %v512_v6, %s577_s21  ;;  %250 = vrot.lane.b32.xlu1 %v512_v6, %s578_s22 }
  0x3b   : > { %258 = vrot.lane.b32.xlu0 %v510_v3, %s579_s23  ;;  %260 = vrot.lane.b32.xlu1 %v511_v5, %s579_s23 }
  0x3f   : > { %270 = vrot.lane.b32.xlu0 %v510_v3, %s580_s24  ;;  %272 = vrot.lane.b32.xlu1 %v511_v5, %s580_s24 }
  0x43   : > { %256 = vrot.lane.b32.xlu0 %v623_v4, %s579_s23  ;;  %268 = vrot.lane.b32.xlu1 %v623_v4, %s580_s24 }
  0x47   : > { %262 = vrot.lane.b32.xlu0 %v512_v6, %s579_s23  ;;  %274 = vrot.lane.b32.xlu1 %v512_v6, %s580_s24 }
  0x4b   : > { %280 = vrot.lane.b32.xlu0 %v623_v4, %s583_s25  ;;  %282 = vrot.lane.b32.xlu1 %v510_v3, %s583_s25 }
  0x4f   : > { %284 = vrot.lane.b32.xlu0 %v511_v5, %s583_s25  ;;  %286 = vrot.lane.b32.xlu1 %v512_v6, %s583_s25 }
  0x53   : > { %343 = vperm.xlu0 %559, %v173_v8  }
  0x85   : > { %v199_v9 = vpop.permute.xlu0 %198  ;;  %v197_v10 = vpop.permute.xlu1 %196 }
  0x86   : > { %v205_v12 = vsel %vm204_vm1, %v197_v10, %v199_v9 }
  0x87   : > { %v295_v19 = vsel %vm292_vm2, %v623_v4, %v205_v12 }
  0x89   : > { %v201_v13 = vpop.permute.xlu0 %200  ;;  %v203_v14 = vpop.permute.xlu1 %202 }
  0x8a   : > { %v206_v15 = vsel %vm204_vm1, %v199_v9, %v201_v13  ;;  %v207_v16 = vsel %vm204_vm1, %v201_v13, %v203_v14 }
  0x8b   : > { %v299_v17 = vsel %vm292_vm2, %v510_v3, %v206_v15  ;;  %v303_v18 = vsel %vm292_vm2, %v564_v11, %v207_v16 }
  0x8c   : > { %359 = vmatprep.subr.bf16.mxu0 %v299_v17  ;;  %526 = vmatpush3.bf16.msra.mxu1 %v303_v18  ;;  %v172_v17 = vld [vmem:[%s687_s1] sm:$0xf] }
  0x8d   : > { %v211_v20 = vpop.permute.xlu0 %210  ;;  %v213_v21 = vpop.permute.xlu1 %212  ;;  %360 = vmatpush1.bf16.msra.mxu0 %v295_v19  ;;  %527 = vmatprep.subr.bf16.mxu1 %v573_v0 }
  0x8e   : > { %v218_v24 = vsel %vm216_vm3, %v211_v20, %v213_v21 }
  0x91   : > { %v223_v22 = vpop.permute.xlu0 %222  ;;  %v225_v23 = vpop.permute.xlu1 %224 }
  0x92   : > { %v230_v25 = vsel %vm228_vm4, %v223_v22, %v225_v23 }
  0x93   : > { %v311_v26 = vsel %vm292_vm2, %v218_v24, %v230_v25 }
  0x94   : > { %361 = vmatprep.subr.bf16.mxu0 %v311_v26 }
  0x95   : > { %v209_v27 = vpop.permute.xlu0 %208  ;;  %v221_v28 = vpop.permute.xlu1 %220 }
  0x96   : > { %v217_v29 = vsel %vm216_vm3, %v209_v27, %v211_v20  ;;  %v229_v30 = vsel %vm228_vm4, %v221_v28, %v223_v22 }
  0x97   : > { %v307_v31 = vsel %vm292_vm2, %v217_v29, %v229_v30 }
  0x98   : > { %362 = vmatpush1.bf16.msra.mxu0 %v307_v31 }
  0x99   : > { %v215_v32 = vpop.permute.xlu0 %214  ;;  %v227_v33 = vpop.permute.xlu1 %226 }
  0x9a   : > { %v219_v34 = vsel %vm216_vm3, %v213_v21, %v215_v32  ;;  %v231_v35 = vsel %vm228_vm4, %v225_v23, %v227_v33 }
  0x9b   : > { %v315_v36 = vsel %vm292_vm2, %v219_v34, %v231_v35 }
  0x9c   : > { %528 = vmatpush3.bf16.msra.mxu1 %v315_v36 }
  0x9d   : > { %v235_v37 = vpop.permute.xlu0 %234  ;;  %v237_v38 = vpop.permute.xlu1 %236  ;;  %529 = vmatprep.subr.bf16.mxu1 %v573_v0 }
  0x9e   : > { %v242_v41 = vsel %vm240_vm5, %v235_v37, %v237_v38 }
  0xa1   : > { %v247_v39 = vpop.permute.xlu0 %246  ;;  %v249_v40 = vpop.permute.xlu1 %248 }
  0xa2   : > { %v254_v42 = vsel %vm252_vm6, %v247_v39, %v249_v40 }
  0xa3   : > { %v323_v43 = vsel %vm292_vm2, %v242_v41, %v254_v42 }
  0xa4   : > { %363 = vmatprep.subr.bf16.mxu0 %v323_v43 }
  0xa5   : > { %v233_v44 = vpop.permute.xlu0 %232  ;;  %v245_v45 = vpop.permute.xlu1 %244 }
  0xa6   : > { %v241_v46 = vsel %vm240_vm5, %v233_v44, %v235_v37  ;;  %v253_v47 = vsel %vm252_vm6, %v245_v45, %v247_v39 }
  0xa7   : > { %v319_v48 = vsel %vm292_vm2, %v241_v46, %v253_v47 }
  0xa8   : > { %364 = vmatpush1.bf16.msra.mxu0 %v319_v48 }
  0xa9   : > { %v239_v49 = vpop.permute.xlu0 %238  ;;  %v251_v50 = vpop.permute.xlu1 %250 }
  0xaa   : > { %v243_v51 = vsel %vm240_vm5, %v237_v38, %v239_v49  ;;  %v255_v52 = vsel %vm252_vm6, %v249_v40, %v251_v50 }
  0xab   : > { %v327_v53 = vsel %vm292_vm2, %v243_v51, %v255_v52 }
  0xac   : > { %530 = vmatpush3.bf16.msra.mxu1 %v327_v53 }
  0xad   : > { %v259_v54 = vpop.permute.xlu0 %258  ;;  %v261_v55 = vpop.permute.xlu1 %260  ;;  %531 = vmatprep.subr.bf16.mxu1 %v573_v0 }
  0xae   : > { %v266_v58 = vsel %vm264_vm7, %v259_v54, %v261_v55 }
  0xb1   : > { %v271_v56 = vpop.permute.xlu0 %270  ;;  %v273_v57 = vpop.permute.xlu1 %272 }
  0xb2   : > { %v278_v59 = vsel %vm276_vm8, %v271_v56, %v273_v57 }
  0xb3   : > { %v335_v60 = vsel %vm292_vm2, %v266_v58, %v278_v59 }
  0xb4   : > { %365 = vmatprep.subr.bf16.mxu0 %v335_v60 }
  0xb5   : > { %v257_v61 = vpop.permute.xlu0 %256  ;;  %v269_v62 = vpop.permute.xlu1 %268 }
  0xb6   : > { %v265_v63 = vsel %vm264_vm7, %v257_v61, %v259_v54  ;;  %v277_v1 = vsel %vm276_vm8, %v269_v62, %v271_v56 }
  0xb7   : > { %v331_v2 = vsel %vm292_vm2, %v265_v63, %v277_v1 }
  0xb8   : > { %366 = vmatpush1.bf16.msra.mxu0 %v331_v2 }
  0xb9   : > { %v263_v3 = vpop.permute.xlu0 %262  ;;  %v275_v4 = vpop.permute.xlu1 %274 }
  0xba   : > { %v267_v5 = vsel %vm264_vm7, %v261_v55, %v263_v3  ;;  %v279_v6 = vsel %vm276_vm8, %v273_v57, %v275_v4 }
  0xbb   : > { %v339_v7 = vsel %vm292_vm2, %v267_v5, %v279_v6 }
  0xbc   : > { %532 = vmatpush3.bf16.msra.mxu1 %v339_v7 }
  0xbd   : > { %v281_v8 = vpop.permute.xlu0 %280  ;;  %v283_v9 = vpop.permute.xlu1 %282  ;;  %533 = vmatprep.subr.bf16.mxu1 %v573_v0 }
  0xbe   : > { %v289_v10 = vsel %vm288_vm9, %v281_v8, %v283_v9 }
  0xbf   : > { %v351_v15 = vsel %vm292_vm2, %v289_v10, 0 }
  0xc1   : > { %v285_v11 = vpop.permute.xlu0 %284  ;;  %v287_v12 = vpop.permute.xlu1 %286 }
  0xc2   : > { %v290_v13 = vsel %vm288_vm9, %v283_v9, %v285_v11  ;;  %v291_v14 = vsel %vm288_vm9, %v285_v11, %v287_v12 }
  0xc3   : > { %513 = vmatprep.subr.msk.bf16.mxu0 %vm292_vm2, %v290_v13  ;;  %v357_v16 = vsel %vm292_vm2, %v291_v14, 0 }
  0xc4   : > { %368 = vmatpush1.bf16.msra.mxu0 %v351_v15  ;;  %534 = vmatpush3.bf16.msra.mxu1 %v357_v16 }
  0xc7   : > { %514 = vmatmul.mubr.msk.bf16.vlgmr.msra.gmra.mrb[0].mxu0 %vm346_vm10, %v172_v17  ;;  %536 = vmatmul.mubr.msk.bf16.vlgmr.msra.gmra.mrb[0].mxu1 %vm346_vm10, %v172_v17 }
  0xd2   : > { %v344_v0 = vpop.permute.xlu0 %343 }
 0x19a   : > { %v393_v18 = vpop.f32.mrb[0].mxu0  ;;  %v434_v19 = vpop.f32.mrb[0].mxu1 }
 0x19b   : > { %v394_v20 = vadd.f32 %v393_v18, %v344_v0  ;;  %v435_v21 = vadd.f32 %v434_v19, %v344_v0  ;;  %v395_v22 = vpop.f32.mrb[1].mxu0  ;;  %v537_v23 = vpop.f32.mrb[1].mxu1 }
 0x19c   : > { %v396_v24 = vadd.f32 %v395_v22, %v344_v0  ;;  %v397_v25 = vpop.f32.mrb[2].mxu0  ;;  %v437_v26 = vpop.f32.mrb[2].mxu1 }
 0x19d   : > { %440 = vst [vmem:[%s170_s6] sm:$0xff] %v394_v20  ;;  %442 = vst [vmem:[%s170_s6 + $0x10] sm:$0xff] %v435_v21  ;;  %v398_v27 = vpop.f32.mrb[3].mxu0  ;;  %v538_v28 = vpop.f32.mrb[3].mxu1 }
 0x19e   : > { %441 = vst [vmem:[%s170_s6 + $0x8] sm:$0xff] %v396_v24 }
 0x19f PF: > { %s13_s12 = sadd.s32 1, %s571_s12  }
 0x1a0   : > { %p10_p4 = scmp.ge.s32.totalorder %s13_s12, 4  }
 0x1a2   :  { %12 = sbr.rel (!%p10_p4) target bundleno = 1 (0x1), region = 62 }

</bundles_post_ra>
